<compile_context>
chip_gen: v6e
topology: v6e:2x2x1
jax: 0.10.0
libtpu: 0.0.40
codegen_flags: <defaults>
</compile_context>

<pallas_src>
import functools

import jax
import jax.numpy as jnp
from jax import lax
from jax.experimental import pallas as pl
from jax.experimental.pallas import tpu as pltpu

_TB_TARGET = 256          # batch rows per tile
_TN_TARGET = 512          # output features per tile
_TK_TARGET = 1024         # reduction (in_features) per tile
_X_RESIDENT_BYTES = 4 << 20   # keep x fully VMEM-resident below this size


def _round_up(v, m):
    return ((v + m - 1) // m) * m


def _choose_tile(dim, target, align):
    """Pick a tile (multiple of `align`) near `target`; return (tile, padded_dim).

    Prefers an exact divisor of the aligned dim (no pad waste); otherwise pads
    the dim up to a multiple of the target-sized tile instead of shrinking to
    many tiny per-step-overhead-dominated tiles.
    """
    dim_a = _round_up(max(dim, 1), align)
    t = min(target, dim_a)
    cand = t
    while cand >= max(align, t // 2):
        if dim_a % cand == 0:
            return cand, dim_a
        cand -= align
    return t, _round_up(dim_a, t)


# --------------------------------------------------------------------------
# Kernels
# --------------------------------------------------------------------------
def _noisy_linear_kernel(x_ref, wmu_ref, wsig_ref, wns_ref, b_ref, o_ref,
                         acc_ref, *, tk, x_resident):
    """y = x @ (mu + sigma_eff * noise).T + bias, tiled over (M, N, K)."""
    k = pl.program_id(2)
    nk = pl.num_programs(2)

    @pl.when(k == 0)
    def _init():
        acc_ref[...] = jnp.zeros_like(acc_ref)

    if x_resident:
        x_blk = x_ref[:, pl.ds(k * tk, tk)]       # x resident: slice K window
    else:
        x_blk = x_ref[...]

    # Noisy weight built on the fly (never written back to HBM).
    w = (wmu_ref[...].astype(jnp.float32)
         + wsig_ref[...].astype(jnp.float32) * wns_ref[...].astype(jnp.float32))

    # x (tb, tk) . w (tn, tk), contracting the shared K dim -> (tb, tn).
    # No transpose of w is materialized; output stays lane-dense on N.
    acc_ref[...] += lax.dot_general(
        x_blk.astype(jnp.float32), w,
        dimension_numbers=(((1,), (1,)), ((), ())),
        preferred_element_type=jnp.float32)

    @pl.when(k == nk - 1)
    def _finalize():
        o_ref[...] = (acc_ref[...]
                      + b_ref[...].astype(jnp.float32)).astype(o_ref.dtype)


def _linear_kernel(x_ref, w_ref, b_ref, o_ref, acc_ref, *, tk, x_resident):
    """Deterministic (noisy=False) path: y = x @ mu.T + bias."""
    k = pl.program_id(2)
    nk = pl.num_programs(2)

    @pl.when(k == 0)
    def _init():
        acc_ref[...] = jnp.zeros_like(acc_ref)

    if x_resident:
        x_blk = x_ref[:, pl.ds(k * tk, tk)]
    else:
        x_blk = x_ref[...]

    acc_ref[...] += lax.dot_general(
        x_blk.astype(jnp.float32), w_ref[...].astype(jnp.float32),
        dimension_numbers=(((1,), (1,)), ((), ())),
        preferred_element_type=jnp.float32)

    @pl.when(k == nk - 1)
    def _finalize():
        o_ref[...] = (acc_ref[...]
                      + b_ref[...].astype(jnp.float32)).astype(o_ref.dtype)


# --------------------------------------------------------------------------
# Forward (jitted wrapper around pallas_call)
# --------------------------------------------------------------------------
@functools.partial(jax.jit, static_argnames=("out_dims", "tn", "tk", "noisy"))
def _noisy_linear_forward(weight_mu, weight_sigma_eff, bias_mu, bias_sigma_eff,
                          x, noise_key, *, out_dims, tn, tk, noisy):
    B, K = x.shape
    N_pad, K_pad = weight_mu.shape
    out_dtype = x.dtype

    # Batch tiling (parameters are already padded/aligned at init).
    tb, B_pad = _choose_tile(B, _TB_TARGET, 8)
    nm, nj, nk = B_pad // tb, N_pad // tn, K_pad // tk

    if B_pad > B or K_pad > K:
        x = jnp.pad(x, ((0, B_pad - B), (0, K_pad - K)))

    x_resident = B_pad * K_pad * x.dtype.itemsize <= _X_RESIDENT_BYTES

    if noisy:
        k_w, k_b = jax.random.split(noise_key)
        # bf16 weight noise halves the extra HBM stream; padded rows/cols of
        # sigma are zero, so noise at padded positions never contributes.
        w_noise = jax.random.normal(k_w, (N_pad, K_pad), dtype=jnp.bfloat16)
        bias_eff = bias_mu + bias_sigma_eff * jax.random.normal(
            k_b, (N_pad,), dtype=jnp.float32)
    else:
        bias_eff = bias_mu
    bias_2d = bias_eff.reshape(1, N_pad).astype(jnp.float32)

    # Block specs: weight tiles walk (j, k); x per batch tile (resident over
    # the whole (j, k) sweep when small); bias per output tile.
    if x_resident:
        x_spec = pl.BlockSpec((tb, K_pad), lambda m, j, k: (m, 0))
        x_block_bytes = tb * K_pad * x.dtype.itemsize
    else:
        x_spec = pl.BlockSpec((tb, tk), lambda m, j, k: (m, k))
        x_block_bytes = tb * tk * x.dtype.itemsize
    w_spec = pl.BlockSpec((tn, tk), lambda m, j, k: (j, k))
    b_spec = pl.BlockSpec((1, tn), lambda m, j, k: (0, j))
    out_spec = pl.BlockSpec((tb, tn), lambda m, j, k: (m, j))

    p_item = jnp.dtype(weight_mu.dtype).itemsize
    if noisy:
        kernel = functools.partial(_noisy_linear_kernel, tk=tk,
                                   x_resident=x_resident)
        inputs = (x, weight_mu, weight_sigma_eff, w_noise, bias_2d)
        in_specs = [x_spec, w_spec, w_spec, w_spec, b_spec]
        w_stream_bytes = N_pad * K_pad * (2 * p_item + 2)      # mu + sigma + bf16 noise
        w_block_bytes = tn * tk * (2 * p_item + 2)
    else:
        kernel = functools.partial(_linear_kernel, tk=tk,
                                   x_resident=x_resident)
        inputs = (x, weight_mu, bias_2d)
        in_specs = [x_spec, w_spec, b_spec]
        w_stream_bytes = N_pad * K_pad * p_item
        w_block_bytes = tn * tk * p_item

    out_block_bytes = tb * tn * jnp.dtype(out_dtype).itemsize
    acc_bytes = tb * tn * 4
    vmem_est = (2 * (x_block_bytes + w_block_bytes + out_block_bytes + tn * 4)
                + acc_bytes)
    vmem_limit = int(min(max(vmem_est + (8 << 20), 32 << 20), 64 << 20))

    cost = pl.CostEstimate(
        flops=2 * B_pad * K_pad * N_pad,
        transcendentals=0,
        bytes_accessed=int(nm * w_stream_bytes
                           + B_pad * K_pad * x.dtype.itemsize
                           + B_pad * N_pad * jnp.dtype(out_dtype).itemsize))

    out = pl.pallas_call(
        kernel,
        out_shape=jax.ShapeDtypeStruct((B_pad, N_pad), out_dtype),
        grid_spec=pltpu.PrefetchScalarGridSpec(
            num_scalar_prefetch=0,
            grid=(nm, nj, nk),
            in_specs=in_specs,
            out_specs=out_spec,
            scratch_shapes=[pltpu.VMEM((tb, tn), jnp.float32)]),
        compiler_params=pltpu.CompilerParams(
            dimension_semantics=("parallel", "parallel", "arbitrary"),
            vmem_limit_bytes=vmem_limit),
        cost_estimate=cost,
    )(*inputs)

    return out[:B, :out_dims]


# --------------------------------------------------------------------------
# Module-like wrapper (parameters padded/aligned once, like the nn.Module)
# --------------------------------------------------------------------------
class NoisyLinear:
    """JAX/Pallas port of the PyTorch NoisyLinear module."""

    def __init__(self, key, in_dims, out_dims, epsilon_sigma=1.0,
                 init_weight_sigma=0.017, init_bias_sigma=0.017,
                 param_dtype=jnp.float32):
        self.in_dims = in_dims
        self.out_dims = out_dims
        self.epsilon_sigma = float(epsilon_sigma)

        # Static tile selection, done once at construction.
        self.tk, self.K_pad = _choose_tile(in_dims, _TK_TARGET, 128)
        self.tn, self.N_pad = _choose_tile(out_dims, _TN_TARGET, 128)
        # Ensure >= 2 output tiles when it costs no padding, so the second
        # v7x TensorCore gets work even when the batch fits in one tile.
        if self.N_pad // self.tn == 1 and self.N_pad % 256 == 0:
            self.tn = self.N_pad // 2

        bound = 1.0 / in_dims ** 0.5
        k_w, k_b = jax.random.split(key)
        wmu = jax.random.uniform(k_w, (out_dims, in_dims),
                                 minval=-bound, maxval=bound,
                                 dtype=jnp.float32)
        wsig = jnp.full((out_dims, in_dims), init_weight_sigma, jnp.float32)
        bmu = jax.random.uniform(k_b, (out_dims,),
                                 minval=-bound, maxval=bound,
                                 dtype=jnp.float32)
        bsig = jnp.full((out_dims,), init_bias_sigma, jnp.float32)

        # Parameters padded/aligned ONCE (zero padding keeps the math exact);
        # epsilon_sigma is folded into sigma once (saves one per-element mul
        # per forward call).
        pw = ((0, self.N_pad - out_dims), (0, self.K_pad - in_dims))
        self.weight_mu = jnp.pad(wmu, pw).astype(param_dtype)
        self.weight_sigma_eff = jnp.pad(wsig * self.epsilon_sigma,
                                        pw).astype(param_dtype)
        self.bias_mu = jnp.pad(bmu, (0, self.N_pad - out_dims))
        self.bias_sigma_eff = jnp.pad(bsig * self.epsilon_sigma,
                                      (0, self.N_pad - out_dims))

    def __call__(self, x, noise_key=None, noisy=True):
        if noisy and noise_key is None:
            raise ValueError("noise_key is required when noisy=True")
        if noise_key is None:
            noise_key = jax.random.PRNGKey(0)   # unused when noisy=False
        return _noisy_linear_forward(
            self.weight_mu, self.weight_sigma_eff,
            self.bias_mu, self.bias_sigma_eff,
            x, noise_key,
            out_dims=self.out_dims, tn=self.tn, tk=self.tk, noisy=noisy)


if __name__ == "__main__":
    in_dims, out_dims, batch = 32, 64, 8

    root = jax.random.PRNGKey(0)
    k_param, k_x, k_noise, k_noise2 = jax.random.split(root, 4)

    layer = NoisyLinear(k_param, in_dims, out_dims)
    x = jax.random.normal(k_x, (batch, in_dims), dtype=jnp.float32)

    wmu = layer.weight_mu[:out_dims, :in_dims].astype(jnp.float32)
    bmu = layer.bias_mu[:out_dims]
    hi = jax.lax.Precision.HIGHEST

    # 1) Deterministic path must match pure-JAX F.linear.
    y_det = jax.block_until_ready(layer(x, noisy=False))
    ref_det = jnp.dot(x, wmu.T, precision=hi) + bmu
    assert y_det.shape == (batch, out_dims)
    assert jnp.allclose(y_det, ref_det, atol=1e-4, rtol=1e-4)

    # 2) Noisy kernel with sigma == 0 exercises the full noisy code path but
    #    must reduce exactly to the deterministic result.
    layer_zero = NoisyLinear(k_param, in_dims, out_dims)
    layer_zero.weight_sigma_eff = jnp.zeros_like(layer_zero.weight_sigma_eff)
    layer_zero.bias_sigma_eff = jnp.zeros_like(layer_zero.bias_sigma_eff)
    y_zero = jax.block_until_ready(layer_zero(x, k_noise, noisy=True))
    assert jnp.allclose(y_zero, ref_det, atol=1e-4, rtol=1e-4)

    # 3) Noisy path against a pure-JAX replica of the exact same noise draw
    #    (noise is generated from the key, so this is reproducible).
    kw_, kb_ = jax.random.split(k_noise)
    wsig = layer.weight_sigma_eff[:out_dims, :in_dims].astype(jnp.float32)
    bsig = layer.bias_sigma_eff[:out_dims]
    wn = jax.random.normal(kw_, (layer.N_pad, layer.K_pad),
                           dtype=jnp.bfloat16)[:out_dims, :in_dims]
    bn = jax.random.normal(kb_, (layer.N_pad,), dtype=jnp.float32)[:out_dims]
    w_eff = wmu + wsig * wn.astype(jnp.float32)
    b_eff = bmu + bsig * bn
    ref_noisy = jnp.dot(x, w_eff.T, precision=hi) + b_eff

    y_noisy = jax.block_until_ready(layer(x, k_noise, noisy=True))
    assert y_noisy.shape == (batch, out_dims)
    assert bool(jnp.all(jnp.isfinite(y_noisy)))
    assert jnp.allclose(y_noisy, ref_noisy, atol=1e-3, rtol=1e-3)

    # 4) Same key -> identical output; different key -> different output.
    y_noisy_2 = jax.block_until_ready(layer(x, k_noise, noisy=True))
    assert jnp.array_equal(y_noisy, y_noisy_2)
    y_other = jax.block_until_ready(layer(x, k_noise2, noisy=True))
    assert not jnp.allclose(y_noisy, y_other, atol=1e-6)

    print("KERNEL_OK")
</pallas_src>

<mosaic_0001>
module attributes {stable_mosaic.version = 11 : i64} {
  func.func @_linear_kernel(%arg0: i32, %arg1: i32, %arg2: i32, %arg3: memref<8x128xf32, #tpu.memory_space<vmem>>, %arg4: memref<128x128xf32, #tpu.memory_space<vmem>>, %arg5: memref<1x128xf32, #tpu.memory_space<vmem>>, %arg6: memref<8x128xf32, #tpu.memory_space<vmem>>, %arg7: memref<8x128xf32, #tpu.memory_space<vmem>>) attributes {dimension_semantics = [#tpu.dimension_semantics<parallel>, #tpu.dimension_semantics<parallel>, #tpu.dimension_semantics<arbitrary>], iteration_bounds = array<i64: 1, 1, 1>, scalar_prefetch = 0 : i64, scratch_operands = 1 : i64, tpu.core_type = #tpu.core_type<tc>, window_params = [{transform_indices = @transform_0, window_bounds = array<i64: 8, 128>}, {transform_indices = @transform_1, window_bounds = array<i64: 128, 128>}, {transform_indices = @transform_2, window_bounds = array<i64: 1, 128>}, {transform_indices = @transform_3, window_bounds = array<i64: 8, 128>}]} {
    %c0_i32 = arith.constant 0 : i32
    %0 = arith.cmpi eq, %arg2, %c0_i32 : i32
    %1 = arith.extui %0 : i1 to i32
    %c0_i32_0 = arith.constant 0 : i32
    %2 = arith.cmpi ne, %1, %c0_i32_0 : i32
    scf.if %2 {
      %cst_9 = arith.constant 0.000000e+00 : f32
      %14 = vector.broadcast %cst_9 : f32 to vector<8x128xf32>
      %c0_10 = arith.constant 0 : index
      %c0_11 = arith.constant 0 : index
      %15 = vector.load %arg7[%c0_10, %c0_11] : memref<8x128xf32, #tpu.memory_space<vmem>>, vector<8x128xf32>
      tpu.vector_store %arg7[%c0_10, %c0_11], %14 {strides = array<i32>} : memref<8x128xf32, #tpu.memory_space<vmem>>, vector<8x128xf32>,
    } else {
    }
    %c128_i32 = arith.constant 128 : i32
    %3 = arith.muli %arg2, %c128_i32 : i32
    %c0 = arith.constant 0 : index
    %4 = arith.index_cast %3 : i32 to index
    %5 = vector.load %arg3[%c0, %4] : memref<8x128xf32, #tpu.memory_space<vmem>>, vector<8x128xf32>
    %c0_1 = arith.constant 0 : index
    %c0_2 = arith.constant 0 : index
    %6 = vector.load %arg7[%c0_1, %c0_2] : memref<8x128xf32, #tpu.memory_space<vmem>>, vector<8x128xf32>
    %c0_3 = arith.constant 0 : index
    %c0_4 = arith.constant 0 : index
    %7 = vector.load %arg4[%c0_3, %c0_4] : memref<128x128xf32, #tpu.memory_space<vmem>>, vector<128x128xf32>
    %cst = arith.constant dense<0.000000e+00> : vector<8x128xf32>
    %8 = tpu.matmul %5, %7, %cst {dimension_numbers = #tpu.dot_dimension_numbers<[1], [1], [0], [0], [0, 0, 1, 0], [], []>} : vector<8x128xf32>, vector<128x128xf32>, vector<8x128xf32> -> vector<8x128xf32>
    %9 = arith.addf %6, %8 : vector<8x128xf32>
    %c0_5 = arith.constant 0 : index
    %c0_6 = arith.constant 0 : index
    %10 = vector.load %arg7[%c0_5, %c0_6] : memref<8x128xf32, #tpu.memory_space<vmem>>, vector<8x128xf32>
    tpu.vector_store %arg7[%c0_5, %c0_6], %9 {strides = array<i32>} : memref<8x128xf32, #tpu.memory_space<vmem>>, vector<8x128xf32>,
    %c0_i32_7 = arith.constant 0 : i32
    %11 = arith.cmpi eq, %arg2, %c0_i32_7 : i32
    %12 = arith.extui %11 : i1 to i32
    %c0_i32_8 = arith.constant 0 : i32
    %13 = arith.cmpi ne, %12, %c0_i32_8 : i32
    scf.if %13 {
      %c0_9 = arith.constant 0 : index
      %c0_10 = arith.constant 0 : index
      %14 = vector.load %arg7[%c0_9, %c0_10] : memref<8x128xf32, #tpu.memory_space<vmem>>, vector<8x128xf32>
      %c0_11 = arith.constant 0 : index
      %c0_12 = arith.constant 0 : index
      %15 = vector.load %arg5[%c0_11, %c0_12] : memref<1x128xf32, #tpu.memory_space<vmem>>, vector<1x128xf32>
      %16 = vector.broadcast %15 : vector<1x128xf32> to vector<8x128xf32>
      %17 = arith.addf %14, %16 : vector<8x128xf32>
      %c0_13 = arith.constant 0 : index
      %c0_14 = arith.constant 0 : index
      %18 = vector.load %arg6[%c0_13, %c0_14] : memref<8x128xf32, #tpu.memory_space<vmem>>, vector<8x128xf32>
      tpu.vector_store %arg6[%c0_13, %c0_14], %17 {strides = array<i32>} : memref<8x128xf32, #tpu.memory_space<vmem>>, vector<8x128xf32>,
    } else {
    }
    return
  }
  func.func @transform_0(%arg0: i32, %arg1: i32, %arg2: i32) -> (i32, i32) {
    %c0_i32 = arith.constant 0 : i32
    %c0_i32_0 = arith.constant 0 : i32
    return %arg0, %c0_i32 : i32, i32
  }
  func.func @transform_1(%arg0: i32, %arg1: i32, %arg2: i32) -> (i32, i32) {
    %c0_i32 = arith.constant 0 : i32
    return %arg1, %arg2 : i32, i32
  }
  func.func @transform_2(%arg0: i32, %arg1: i32, %arg2: i32) -> (i32, i32) {
    %c0_i32 = arith.constant 0 : i32
    %c0_i32_0 = arith.constant 0 : i32
    return %c0_i32, %arg1 : i32, i32
  }
  func.func @transform_3(%arg0: i32, %arg1: i32, %arg2: i32) -> (i32, i32) {
    %c0_i32 = arith.constant 0 : i32
    return %arg0, %arg1 : i32, i32
  }
}

</mosaic_0001>

<bundles_post_ra>
// kernel: _noisy_linear_forward.1
= control target key start
LH: loop header
LB: loop body
LE: loop exit
PB: predicated region body
PF: predicated region fallthrough
CT: control target
= control target key end

     0   :  { %8 = vsyncpa [#allocation4], 0  ;;  %s298_s0 = inlined_call_operand.vmem [shape: f32[8,128], index: 0, kind: input, shape index: {}]   ;;  %s299_s1 = inlined_call_operand.hbm [shape: f32[128,128], index: 1, kind: input, shape index: {}]   ;;  %s300_s2 = inlined_call_operand.vmem [shape: f32[1,128], index: 2, kind: input, shape index: {}]   ;;  %s301_s3 = inlined_call_operand.hbm [shape: f32[8,128], index: 3, kind: output, shape index: {}]  }
   0x1   :  { %9 = vsyncpa [#allocation5], 0  ;;  %s260_s12 = smov [#allocation3]  }
   0x2   :  { %s17_s13 = sshll.u32 %s260_s12, 4  ;;  %s18_s13 = int_to_ptr.vmem [resolvable:$true] %s17_s13 }
   0x3   :  { %s224_s14 = scalar_lea.vmem %s18_s13, 2048  ;;  %p229_p1 = scmp.lt.s32.totalorder %s18_s13, %s18_s13 }
   0x4   :  { %p225_p0 = scmp.ne.s32.totalorder %s18_s13, %s224_s14  ;;  %p230_p2 = scmp.lt.s32.totalorder %s224_s14, %s224_s14 }
   0x6   :  { %p231_p3 = por %p230_p2, %p229_p1 }
   0x8   :  { %p232_p4 = pnand %p231_p3, %p225_p0 }
   0xa   :  { %235 = shalt.err (!%p232_p4)
}
   0xb   :  { %s261_s15 = smov 128   ;;  %s262_s16 = smov 8  }
   0xc   :  { %23 = dma.hbm_to_vmem [thread:$0]  %s299_s1, 2048, %s18_s13, [#allocation4], %s261_s15, %s261_s15, %s262_s16  }
   0xd   :  { %256 = dma.done.wait [#allocation4], 2048  }
   0xe   :  { %257 = vsyncadd [#allocation4], 4294965248  ;;  %v263_v0 = vmov 0.0   ;;  %vm264_vm0 = vmmov 0   ;;  %v55_v1 = vld [vmem:[#allocation3 + $0x78] sm:$0xff]  ;;  %v54_v2 = vld [vmem:[#allocation3 + $0x70] sm:$0xff] }
   0xf   :  { %175 = vmatprep.subr.mxu0 %v263_v0  ;;  %207 = vmatprep.mubr.msk.f32.mxu0 %vm264_vm0, %v263_v0  ;;  %v53_v3 = vld [vmem:[#allocation3 + $0x68] sm:$0xff]  ;;  %v52_v4 = vld [vmem:[#allocation3 + $0x60] sm:$0xff]  ;;  %v51_v5 = vld [vmem:[#allocation3 + $0x58] sm:$0xff]  ;;  %s265_s22 = smov [#allocation6]  }
  0x10   :  { %176 = vmatpush3.xpose.msra.mxu0 %v55_v1  ;;  %v50_v6 = vld [vmem:[#allocation3 + $0x50] sm:$0xff]  ;;  %v49_v7 = vld [vmem:[#allocation3 + $0x48] sm:$0xff]  ;;  %v48_v8 = vld [vmem:[#allocation3 + $0x40] sm:$0xff]  ;;  %s147_s23 = sshll.u32 %s265_s22, 4  ;;  %s148_s23 = int_to_ptr.vmem [resolvable:$true] %s147_s23 }
  0x11   :  { %177 = vmatprep.subr.mxu0 %v263_v0  ;;  %v47_v9 = vld [vmem:[#allocation3 + $0x38] sm:$0xff]  ;;  %v46_v10 = vld [vmem:[#allocation3 + $0x30] sm:$0xff]  ;;  %v45_v11 = vld [vmem:[#allocation3 + $0x28] sm:$0xff]  ;;  %s236_s24 = scalar_lea.vmem %s148_s23, 128  ;;  %p241_p6 = scmp.lt.s32.totalorder %s148_s23, %s148_s23 }
  0x12   :  { %v44_v12 = vld [vmem:[#allocation3 + $0x20] sm:$0xff]  ;;  %v43_v13 = vld [vmem:[#allocation3 + $0x18] sm:$0xff]  ;;  %v42_v14 = vld [vmem:[#allocation3 + $0x10] sm:$0xff]  ;;  %p237_p5 = scmp.ne.s32.totalorder %s148_s23, %s236_s24  ;;  %p242_p7 = scmp.lt.s32.totalorder %s236_s24, %s236_s24 }
  0x13   :  { %v41_v15 = vld [vmem:[#allocation3 + $0x8] sm:$0xff]  ;;  %v40_v16 = vld [vmem:[#allocation3] sm:$0xff] }
  0x14   :  { %178 = vmatpush3.xpose.msra.mxu0 %v54_v2  ;;  %v38_v17 = vld [vmem:[%s298_s0] sm:$0xff]  ;;  %p243_p8 = por %p242_p7, %p241_p6 }
  0x15   :  { %179 = vmatprep.subr.mxu0 %v263_v0  ;;  %v157_v18 = vld [vmem:[%s300_s2] ss:$0 sm:$0xff] }
  0x16   :  { %p244_p9 = pnand %p243_p8, %p237_p5 }
  0x18   :  { %180 = vmatpush3.xpose.msra.mxu0 %v53_v3 }
  0x19   :  { %181 = vmatprep.subr.mxu0 %v263_v0 }
  0x1c   :  { %182 = vmatpush3.xpose.msra.mxu0 %v52_v4 }
  0x1d   :  { %183 = vmatprep.subr.mxu0 %v263_v0 }
  0x20   :  { %184 = vmatpush3.xpose.msra.mxu0 %v51_v5 }
  0x21   :  { %185 = vmatprep.subr.mxu0 %v263_v0 }
  0x24   :  { %186 = vmatpush3.xpose.msra.mxu0 %v50_v6 }
  0x25   :  { %187 = vmatprep.subr.mxu0 %v263_v0 }
  0x28   :  { %188 = vmatpush3.xpose.msra.mxu0 %v49_v7 }
  0x29   :  { %189 = vmatprep.subr.mxu0 %v263_v0 }
  0x2c   :  { %190 = vmatpush3.xpose.msra.mxu0 %v48_v8 }
  0x2d   :  { %191 = vmatprep.subr.mxu0 %v263_v0 }
  0x30   :  { %192 = vmatpush3.xpose.msra.mxu0 %v47_v9 }
  0x31   :  { %193 = vmatprep.subr.mxu0 %v263_v0 }
  0x34   :  { %194 = vmatpush3.xpose.msra.mxu0 %v46_v10 }
  0x35   :  { %195 = vmatprep.subr.mxu0 %v263_v0 }
  0x38   :  { %196 = vmatpush3.xpose.msra.mxu0 %v45_v11 }
  0x39   :  { %197 = vmatprep.subr.mxu0 %v263_v0 }
  0x3c   :  { %198 = vmatpush3.xpose.msra.mxu0 %v44_v12 }
  0x3d   :  { %199 = vmatprep.subr.mxu0 %v263_v0 }
  0x40   :  { %200 = vmatpush3.xpose.msra.mxu0 %v43_v13 }
  0x41   :  { %201 = vmatprep.subr.mxu0 %v263_v0 }
  0x44   :  { %202 = vmatpush3.xpose.msra.mxu0 %v42_v14 }
  0x45   :  { %203 = vmatprep.subr.mxu0 %v263_v0 }
  0x48   :  { %204 = vmatpush3.xpose.msra.mxu0 %v41_v15 }
  0x49   :  { %205 = vmatprep.subr.mxu0 %v263_v0 }
  0x4c   :  { %206 = vmatpush3.xpose.msra.mxu0 %v40_v16 }
  0x4f   :  { %208 = vmatmul.mubr.f32.vlgmr.msra.gmra.mxu0 %v38_v17 }
 0x10f   :  { %v122_v19 = vpop.f32.mrf.mxu0 }
 0x110   :  { %v139_v20 = vadd.f32 %v157_v18, %v122_v19 }
 0x111   :  { %v209_v21 = vpop.f32.mrf.mxu0 }
 0x112   :  { %140 = vst [vmem:[#allocation6] sm:$0xff] %v139_v20 }
 0x113   :  { %247 = shalt.err (!%p244_p9)
}
 0x114   :  { %150 = dma.vmem_to_hbm [thread:$0]  %s148_s23, 128, %s301_s3, [#allocation5]  }
 0x115   :  { %258 = dma.done.wait [#allocation5], 128  }
 0x116   :  { %259 = vsyncadd [#allocation5], 4294967168 }
 0x117   :  { %154 = vsyncpa [#allocation4], 1 }
 0x118   :  { %155 = vsyncpa [#allocation5], 1 }

</bundles_post_ra>
